<compile_context>
chip_gen: v7x
topology: tpu7x:2x2x1
jax: 0.10.0
libtpu: 0.0.40
codegen_flags: <defaults>
</compile_context>

<pallas_src>
import functools

import jax
import jax.numpy as jnp
from jax.experimental import pallas as pl
from jax.experimental.pallas import tpu as pltpu


# ----------------------------------------------------------------------------
# helpers
# ----------------------------------------------------------------------------
def _round_up(x, m):
    return ((x + m - 1) // m) * m


def _pick_tile(n, target):
    """Largest multiple of 128 that divides n (n is a multiple of 128) and is
    <= target.  Avoids padding the array beyond the 128 granule."""
    target = max(128, min(target, n))
    start = target - (target % 128)
    for cand in range(start, 127, -128):
        if n % cand == 0:
            return cand
    return n


# ----------------------------------------------------------------------------
# stage 1: H = feat @ W  (tiny prologue; computed once, f32)
# ----------------------------------------------------------------------------
def _project_kernel(feat_ref, w_ref, h_ref):
    h_ref[...] = jnp.dot(
        feat_ref[...], w_ref[...], preferred_element_type=jnp.float32
    ).astype(h_ref.dtype)


def _project(feat_p, weight, *, block_rows=512):
    Np, F = feat_p.shape
    O = weight.shape[1]
    if Np <= block_rows or Np % 128 != 0:
        bp, grid = Np, (1,)
    else:
        bp = _pick_tile(Np, block_rows)
        grid = (Np // bp,)

    return pl.pallas_call(
        _project_kernel,
        out_shape=jax.ShapeDtypeStruct((Np, O), jnp.float32),
        grid_spec=pltpu.PrefetchScalarGridSpec(
            num_scalar_prefetch=0,
            grid=grid,
            in_specs=[
                pl.BlockSpec((bp, F), lambda i: (i, 0)),   # feat row tile
                pl.BlockSpec((F, O), lambda i: (0, 0)),    # weight, resident
            ],
            out_specs=pl.BlockSpec((bp, O), lambda i: (i, 0)),
        ),
        compiler_params=pltpu.CompilerParams(dimension_semantics=("parallel",)),
    )(feat_p, weight)


# ----------------------------------------------------------------------------
# stage 2: out = adj @ H   (HBM-bound SpMM, dense adj)
# ----------------------------------------------------------------------------
def _spmm_kernel(adj_ref, h_ref, out_ref, *, bk, h_resident):
    k = pl.program_id(1)

    @pl.when(k == 0)
    def _():
        out_ref[...] = jnp.zeros_like(out_ref)

    if h_resident:
        # H is fully resident in VMEM; slice the K-chunk for this step.
        start = pl.multiple_of(k * bk, 128)
        h = h_ref[pl.ds(start, bk), :]
    else:
        h = h_ref[...]

    # Accumulate directly into the (f32) output block: its block index is
    # constant over k, so it stays resident across the whole reduction.
    out_ref[...] += jnp.dot(adj_ref[...], h, preferred_element_type=jnp.float32)


def decoder_pallas(feat, adj, weight, *, block_m=1024, block_k=1024,
                   vmem_limit_bytes=None):
    """Pallas implementation of Decoder.forward: adj @ (feat @ weight)."""
    N, F = feat.shape
    Nr, Nc = adj.shape
    assert Nc == N, "adj columns must match feat rows"
    Fw, O = weight.shape
    assert Fw == F, "weight rows must match feat columns"

    out_dtype = feat.dtype
    SMALL = 1024  # single-block threshold: adj <= 4 MiB f32, fits VMEM anywhere

    if Nr <= SMALL and N <= SMALL:
        # Small-N fast path: one grid step, full-array blocks, zero padding.
        Nm, Nk = Nr, N
        bm, bk = Nr, N
        adj_p, feat_p = adj, feat
    else:
        # Pad only to the 128 granule (NOT up to the tile size) and pick tiles
        # that exactly divide the 128-rounded sizes, so no extra full copy of
        # adj is made when N is already 128-aligned.
        Nm, Nk = _round_up(Nr, 128), _round_up(N, 128)
        bm = _pick_tile(Nm, block_m)
        bk = _pick_tile(Nk, block_k)
        adj_p = adj if (Nm == Nr and Nk == N) else jnp.pad(
            adj, ((0, Nm - Nr), (0, Nk - N)))
        feat_p = feat if Nk == N else jnp.pad(feat, ((0, Nk - N), (0, 0)))

    # --- stage 1: H = feat @ W, computed exactly once --------------------
    h = _project(feat_p, weight)

    # --- stage 2: out = adj @ H ------------------------------------------
    grid_m, grid_k = Nm // bm, Nk // bk
    # Keep H fully resident (single DMA) when it is small; 2 MiB covers
    # N up to ~16k at O=32 and stays well inside the v5e scoped-VMEM default
    # together with 1024x1024 double-buffered adj tiles.
    h_resident = (grid_k > 1) and (Nk * O * 4 <= 2 * 1024 * 1024)
    if h_resident:
        h_spec = pl.BlockSpec((Nk, O), lambda i, k: (0, 0))
    else:
        h_spec = pl.BlockSpec((bk, O), lambda i, k: (k, 0))

    cp_kwargs = dict(dimension_semantics=("parallel", "arbitrary"))
    if vmem_limit_bytes is not None:
        cp_kwargs["vmem_limit_bytes"] = vmem_limit_bytes

    out_p = pl.pallas_call(
        functools.partial(_spmm_kernel, bk=bk, h_resident=h_resident),
        out_shape=jax.ShapeDtypeStruct((Nm, O), jnp.float32),
        grid_spec=pltpu.PrefetchScalarGridSpec(
            num_scalar_prefetch=0,
            grid=(grid_m, grid_k),
            in_specs=[
                pl.BlockSpec((bm, bk), lambda i, k: (i, k)),  # adj tile (the stream)
                h_spec,                                       # H (resident or K-tiled)
            ],
            out_specs=pl.BlockSpec((bm, O), lambda i, k: (i, 0)),
        ),
        compiler_params=pltpu.CompilerParams(**cp_kwargs),
    )(adj_p, h)

    return out_p[:Nr].astype(out_dtype)


# ----------------------------------------------------------------------------
# reference + demo
# ----------------------------------------------------------------------------
def decoder_ref(feat, adj, weight):
    """Pure-JAX reference matching the PyTorch forward."""
    x = jnp.dot(feat, weight)
    return jnp.dot(adj, x)


def xavier_uniform(key, shape, dtype=jnp.float32):
    fan_in, fan_out = shape[0], shape[1]
    bound = (6.0 / (fan_in + fan_out)) ** 0.5
    return jax.random.uniform(key, shape, dtype=dtype, minval=-bound, maxval=bound)


def _make_inputs(key, N, in_feat, out_feat):
    k_feat, k_w, k_adj = jax.random.split(key, 3)
    feat = jax.random.normal(k_feat, (N, in_feat), dtype=jnp.float32)
    weight = xavier_uniform(k_w, (in_feat, out_feat))
    # Row-normalized random adjacency (the "sparse" adj of spmm, held densely).
    mask = (jax.random.uniform(k_adj, (N, N)) < 0.05).astype(jnp.float32)
    adj_dense = mask + jnp.eye(N, dtype=jnp.float32)
    deg = jnp.maximum(adj_dense.sum(axis=1, keepdims=True), 1.0)
    return feat, adj_dense / deg, weight


if __name__ == "__main__":
    key0, key1 = jax.random.split(jax.random.PRNGKey(0))

    # Small module-scale case: N=512 -> single-block path (no tiling, no padding).
    feat, adj, weight = _make_inputs(key0, 512, 64, 32)
    out = jax.block_until_ready(decoder_pallas(feat, adj, weight))
    ref = decoder_ref(feat, adj, weight)
    assert out.shape == (512, 32)
    assert jnp.allclose(out, ref, atol=1e-4, rtol=1e-4), float(
        jnp.max(jnp.abs(out - ref)))

    # Ragged tiled case: N=1300 pads only to 1408 (next 128 multiple); exercises
    # the K-accumulation grid, tile picking and the resident-H dynamic slice.
    feat2, adj2, weight2 = _make_inputs(key1, 1300, 64, 32)
    out2 = jax.block_until_ready(
        decoder_pallas(feat2, adj2, weight2, block_m=512, block_k=512))
    ref2 = decoder_ref(feat2, adj2, weight2)
    assert out2.shape == (1300, 32)
    assert jnp.allclose(out2, ref2, atol=1e-4, rtol=1e-4), float(
        jnp.max(jnp.abs(out2 - ref2)))

    print("KERNEL_OK")
</pallas_src>

<mosaic_0001>
module attributes {stable_mosaic.version = 11 : i64} {
  func.func @_project_kernel(%arg0: i32, %arg1: memref<512x64xf32, #tpu.memory_space<vmem>>, %arg2: memref<64x32xf32, #tpu.memory_space<vmem>>, %arg3: memref<512x32xf32, #tpu.memory_space<vmem>>) attributes {dimension_semantics = [#tpu.dimension_semantics<parallel>], iteration_bounds = array<i64: 1>, scalar_prefetch = 0 : i64, scratch_operands = 0 : i64, tpu.core_type = #tpu.core_type<tc>, window_params = [{transform_indices = @transform_0, window_bounds = array<i64: 512, 64>}, {pipeline_mode = #tpu.pipeline_mode<synchronous>, transform_indices = @transform_1, window_bounds = array<i64: 64, 32>}, {transform_indices = @transform_2, window_bounds = array<i64: 512, 32>}]} {
    %c0 = arith.constant 0 : index
    %c0_0 = arith.constant 0 : index
    %0 = vector.load %arg1[%c0, %c0_0] : memref<512x64xf32, #tpu.memory_space<vmem>>, vector<512x64xf32>
    %c0_1 = arith.constant 0 : index
    %c0_2 = arith.constant 0 : index
    %1 = vector.load %arg2[%c0_1, %c0_2] : memref<64x32xf32, #tpu.memory_space<vmem>>, vector<64x32xf32>
    %cst = arith.constant dense<0.000000e+00> : vector<512x32xf32>
    %2 = tpu.matmul %0, %1, %cst {dimension_numbers = #tpu.dot_dimension_numbers<[1], [0], [0], [1], [0, 0, 1, 1], [], []>} : vector<512x64xf32>, vector<64x32xf32>, vector<512x32xf32> -> vector<512x32xf32>
    %c0_3 = arith.constant 0 : index
    %c0_4 = arith.constant 0 : index
    %3 = vector.load %arg3[%c0_3, %c0_4] : memref<512x32xf32, #tpu.memory_space<vmem>>, vector<512x32xf32>
    tpu.vector_store %arg3[%c0_3, %c0_4], %2 {strides = array<i32>} : memref<512x32xf32, #tpu.memory_space<vmem>>, vector<512x32xf32>,
    return
  }
  func.func @transform_0(%arg0: i32) -> (i32, i32) {
    %c0_i32 = arith.constant 0 : i32
    %c0_i32_0 = arith.constant 0 : i32
    return %arg0, %c0_i32 : i32, i32
  }
  func.func @transform_1(%arg0: i32) -> (i32, i32) {
    %c0_i32 = arith.constant 0 : i32
    %c0_i32_0 = arith.constant 0 : i32
    %c0_i32_1 = arith.constant 0 : i32
    return %c0_i32, %c0_i32_0 : i32, i32
  }
  func.func @transform_2(%arg0: i32) -> (i32, i32) {
    %c0_i32 = arith.constant 0 : i32
    %c0_i32_0 = arith.constant 0 : i32
    return %arg0, %c0_i32 : i32, i32
  }
}

</mosaic_0001>

<bundles_post_ra>
// kernel: tpu_custom_call.1
= control target key start
LH: loop header
LB: loop body
LE: loop exit
PB: predicated region body
PF: predicated region fallthrough
CT: control target
= control target key end

     0   :  { %vm83_vm0 = vcmask 523264   ;;  %vm661_vm1 = vcmask 261120   ;;  %s1553_s1 = inlined_call_operand.vmem [shape: f32[64,32], index: 1, kind: input, shape index: {}]   ;;  %s1554_s0 = inlined_call_operand.vmem [shape: f32[512,64], index: 0, kind: input, shape index: {}]   ;;  %s1555_s2 = inlined_call_operand.vmem [shape: f32[512,32], index: 2, kind: output, shape index: {}]  }
   0x1   :  { %v75_v0 = vld [vmem:[%s1553_s1] sm:$0xff]  ;;  %v76_v1 = vld [vmem:[%s1553_s1 + $0x8] sm:$0xff]  ;;  %v77_v2 = vld [vmem:[%s1553_s1 + $0x10] sm:$0xff] }
   0x2   :  { %v978_v3 = vpack.c.bf16 %v76_v1, %v75_v0  ;;  %v78_v4 = vld [vmem:[%s1553_s1 + $0x18] sm:$0xff]  ;;  %v79_v6 = vld [vmem:[%s1553_s1 + $0x20] sm:$0xff]  ;;  %v80_v7 = vld [vmem:[%s1553_s1 + $0x28] sm:$0xff] }
   0x3   :  { %v982_v5 = vpack.c.bf16 %v78_v4, %v77_v2  ;;  %v11_v8 = vld [vmem:[%s1554_s0] sm:$0xff]  ;;  %v986_v10 = vpack.c.bf16 %v80_v7, %v79_v6  ;;  %v81_v11 = vld [vmem:[%s1553_s1 + $0x30] sm:$0xff]  ;;  %v82_v12 = vld [vmem:[%s1553_s1 + $0x38] sm:$0xff] }
   0x4   :  { %979 = vmatprep.subr.bf16.mxu0 %v978_v3  ;;  %994 = vmatprep.subr.bf16.mxu1 %v978_v3  ;;  %v43_v9 = vld [vmem:[%s1554_s0 + $0x100] sm:$0xff]  ;;  %v990_v13 = vpack.c.bf16 %v82_v12, %v81_v11  ;;  %v12_v14 = vld [vmem:[%s1554_s0 + $0x8] sm:$0xff]  ;;  %v13_v16 = vld [vmem:[%s1554_s0 + $0x10] sm:$0xff] }
   0x5   :  { %981 = vmatpush3.bf16.msra.mxu0 %v978_v3  ;;  %998 = vmatpush3.bf16.msra.mxu1 %v978_v3  ;;  %v44_v15 = vld [vmem:[%s1554_s0 + $0x108] sm:$0xff]  ;;  %v45_v17 = vld [vmem:[%s1554_s0 + $0x110] sm:$0xff]  ;;  %v14_v18 = vld [vmem:[%s1554_s0 + $0x18] sm:$0xff] }
   0x6   :  { %983 = vmatprep.subr.bf16.mxu0 %v982_v5  ;;  %995 = vmatprep.subr.bf16.mxu1 %v982_v5  ;;  %v46_v19 = vld [vmem:[%s1554_s0 + $0x118] sm:$0xff]  ;;  %v15_v20 = vld [vmem:[%s1554_s0 + $0x20] sm:$0xff]  ;;  %v16_v22 = vld [vmem:[%s1554_s0 + $0x28] sm:$0xff] }
   0x7   :  { %882 = vmatprep.mubr.msk.f32.mxu0 %vm83_vm0, %v11_v8  ;;  %930 = vmatprep.mubr.msk.f32.mxu1 %vm83_vm0, %v43_v9  ;;  %v47_v21 = vld [vmem:[%s1554_s0 + $0x120] sm:$0xff]  ;;  %v48_v23 = vld [vmem:[%s1554_s0 + $0x128] sm:$0xff]  ;;  %v17_v24 = vld [vmem:[%s1554_s0 + $0x30] sm:$0xff] }
   0x8   :  { %v49_v25 = vld [vmem:[%s1554_s0 + $0x130] sm:$0xff]  ;;  %v18_v26 = vld [vmem:[%s1554_s0 + $0x38] sm:$0xff]  ;;  %v19_v28 = vld [vmem:[%s1554_s0 + $0x40] sm:$0xff] }
   0x9   :  { %985 = vmatpush3.bf16.msra.mxu0 %v982_v5  ;;  %999 = vmatpush3.bf16.msra.mxu1 %v982_v5  ;;  %v50_v27 = vld [vmem:[%s1554_s0 + $0x138] sm:$0xff]  ;;  %v51_v29 = vld [vmem:[%s1554_s0 + $0x140] sm:$0xff]  ;;  %v20_v30 = vld [vmem:[%s1554_s0 + $0x48] sm:$0xff] }
   0xa   :  { %987 = vmatprep.subr.bf16.mxu0 %v986_v10  ;;  %996 = vmatprep.subr.bf16.mxu1 %v986_v10  ;;  %v52_v31 = vld [vmem:[%s1554_s0 + $0x148] sm:$0xff]  ;;  %v21_v32 = vld [vmem:[%s1554_s0 + $0x50] sm:$0xff]  ;;  %v22_v34 = vld [vmem:[%s1554_s0 + $0x58] sm:$0xff] }
   0xb   :  { %v53_v33 = vld [vmem:[%s1554_s0 + $0x150] sm:$0xff]  ;;  %v54_v35 = vld [vmem:[%s1554_s0 + $0x158] sm:$0xff]  ;;  %v23_v36 = vld [vmem:[%s1554_s0 + $0x60] sm:$0xff] }
   0xc   :  { %v55_v37 = vld [vmem:[%s1554_s0 + $0x160] sm:$0xff]  ;;  %v24_v38 = vld [vmem:[%s1554_s0 + $0x68] sm:$0xff]  ;;  %v25_v40 = vld [vmem:[%s1554_s0 + $0x70] sm:$0xff] }
   0xd   :  { %989 = vmatpush3.bf16.msra.mxu0 %v986_v10  ;;  %1000 = vmatpush3.bf16.msra.mxu1 %v986_v10  ;;  %v56_v39 = vld [vmem:[%s1554_s0 + $0x168] sm:$0xff]  ;;  %v57_v41 = vld [vmem:[%s1554_s0 + $0x170] sm:$0xff]  ;;  %v26_v42 = vld [vmem:[%s1554_s0 + $0x78] sm:$0xff] }
   0xe   :  { %991 = vmatprep.subr.bf16.mxu0 %v990_v13  ;;  %997 = vmatprep.subr.bf16.mxu1 %v990_v13  ;;  %v58_v43 = vld [vmem:[%s1554_s0 + $0x178] sm:$0xff]  ;;  %v27_v44 = vld [vmem:[%s1554_s0 + $0x80] sm:$0xff]  ;;  %v28_v46 = vld [vmem:[%s1554_s0 + $0x88] sm:$0xff] }
   0xf   :  { %v59_v45 = vld [vmem:[%s1554_s0 + $0x180] sm:$0xff]  ;;  %v60_v47 = vld [vmem:[%s1554_s0 + $0x188] sm:$0xff]  ;;  %v29_v48 = vld [vmem:[%s1554_s0 + $0x90] sm:$0xff] }
  0x10   :  { %v61_v49 = vld [vmem:[%s1554_s0 + $0x190] sm:$0xff]  ;;  %v30_v50 = vld [vmem:[%s1554_s0 + $0x98] sm:$0xff]  ;;  %v31_v52 = vld [vmem:[%s1554_s0 + $0xa0] sm:$0xff] }
  0x11   :  { %993 = vmatpush3.bf16.msra.mxu0 %v990_v13  ;;  %1001 = vmatpush3.bf16.msra.mxu1 %v990_v13  ;;  %v62_v51 = vld [vmem:[%s1554_s0 + $0x198] sm:$0xff]  ;;  %v63_v53 = vld [vmem:[%s1554_s0 + $0x1a0] sm:$0xff]  ;;  %v32_v54 = vld [vmem:[%s1554_s0 + $0xa8] sm:$0xff] }
  0x12   :  { %v64_v55 = vld [vmem:[%s1554_s0 + $0x1a8] sm:$0xff]  ;;  %v33_v56 = vld [vmem:[%s1554_s0 + $0xb0] sm:$0xff]  ;;  %v34_v58 = vld [vmem:[%s1554_s0 + $0xb8] sm:$0xff] }
  0x13   :  { %v65_v57 = vld [vmem:[%s1554_s0 + $0x1b0] sm:$0xff]  ;;  %v66_v59 = vld [vmem:[%s1554_s0 + $0x1b8] sm:$0xff]  ;;  %v35_v60 = vld [vmem:[%s1554_s0 + $0xc0] sm:$0xff] }
  0x14   :  { %883 = vmatmul.mubr.msk.f32.vlgmr.msra.gmra.mrb[0].mxu0 %vm83_vm0, %v12_v14  ;;  %931 = vmatmul.mubr.msk.f32.vlgmr.msra.gmra.mrb[0].mxu1 %vm83_vm0, %v44_v15  ;;  %v67_v61 = vld [vmem:[%s1554_s0 + $0x1c0] sm:$0xff]  ;;  %v36_v62 = vld [vmem:[%s1554_s0 + $0xc8] sm:$0xff]  ;;  %v37_v0 = vld [vmem:[%s1554_s0 + $0xd0] sm:$0xff] }
  0x15   :  { %885 = vmatprep.mubr.msk.f32.mxu0 %vm83_vm0, %v13_v16  ;;  %933 = vmatprep.mubr.msk.f32.mxu1 %vm83_vm0, %v45_v17  ;;  %v68_v63 = vld [vmem:[%s1554_s0 + $0x1c8] sm:$0xff]  ;;  %v69_v1 = vld [vmem:[%s1554_s0 + $0x1d0] sm:$0xff]  ;;  %v38_v2 = vld [vmem:[%s1554_s0 + $0xd8] sm:$0xff] }
  0x16   :  { %v70_v3 = vld [vmem:[%s1554_s0 + $0x1d8] sm:$0xff]  ;;  %v39_v4 = vld [vmem:[%s1554_s0 + $0xe0] sm:$0xff]  ;;  %v40_v6 = vld [vmem:[%s1554_s0 + $0xe8] sm:$0xff] }
  0x17   :  { %v71_v5 = vld [vmem:[%s1554_s0 + $0x1e0] sm:$0xff]  ;;  %v72_v7 = vld [vmem:[%s1554_s0 + $0x1e8] sm:$0xff]  ;;  %v41_v8 = vld [vmem:[%s1554_s0 + $0xf0] sm:$0xff] }
  0x18   :  { %886 = vmatmul.mubr.msk.f32.gmra.mrb[2].mxu0 %vm83_vm0, %v14_v18  ;;  %934 = vmatmul.mubr.msk.f32.gmra.mrb[2].mxu1 %vm83_vm0, %v46_v19  ;;  %v73_v9 = vld [vmem:[%s1554_s0 + $0x1f0] sm:$0xff]  ;;  %v42_v10 = vld [vmem:[%s1554_s0 + $0xf8] sm:$0xff] }
  0x19   :  { %888 = vmatprep.mubr.msk.f32.mxu0 %vm83_vm0, %v15_v20  ;;  %936 = vmatprep.mubr.msk.f32.mxu1 %vm83_vm0, %v47_v21  ;;  %v74_v11 = vld [vmem:[%s1554_s0 + $0x1f8] sm:$0xff] }
  0x1c   :  { %889 = vmatmul.mubr.msk.f32.gmra.mrb[4].mxu0 %vm83_vm0, %v16_v22  ;;  %937 = vmatmul.mubr.msk.f32.gmra.mrb[4].mxu1 %vm83_vm0, %v48_v23 }
  0x1d   :  { %891 = vmatprep.mubr.msk.f32.mxu0 %vm83_vm0, %v17_v24  ;;  %939 = vmatprep.mubr.msk.f32.mxu1 %vm83_vm0, %v49_v25 }
  0x20   :  { %892 = vmatmul.mubr.msk.f32.gmra.mrb[6].mxu0 %vm83_vm0, %v18_v26  ;;  %940 = vmatmul.mubr.msk.f32.gmra.mrb[6].mxu1 %vm83_vm0, %v50_v27 }
  0x21   :  { %894 = vmatprep.mubr.msk.f32.mxu0 %vm83_vm0, %v19_v28  ;;  %942 = vmatprep.mubr.msk.f32.mxu1 %vm83_vm0, %v51_v29 }
  0x24   :  { %895 = vmatmul.mubr.msk.f32.gmra.mrb[8].mxu0 %vm83_vm0, %v20_v30  ;;  %943 = vmatmul.mubr.msk.f32.gmra.mrb[8].mxu1 %vm83_vm0, %v52_v31 }
  0x25   :  { %897 = vmatprep.mubr.msk.f32.mxu0 %vm83_vm0, %v21_v32  ;;  %945 = vmatprep.mubr.msk.f32.mxu1 %vm83_vm0, %v53_v33 }
  0x28   :  { %898 = vmatmul.mubr.msk.f32.gmra.mrb[10].mxu0 %vm83_vm0, %v22_v34  ;;  %946 = vmatmul.mubr.msk.f32.gmra.mrb[10].mxu1 %vm83_vm0, %v54_v35 }
  0x29   :  { %900 = vmatprep.mubr.msk.f32.mxu0 %vm83_vm0, %v23_v36  ;;  %948 = vmatprep.mubr.msk.f32.mxu1 %vm83_vm0, %v55_v37 }
  0x2c   :  { %901 = vmatmul.mubr.msk.f32.gmra.mrb[12].mxu0 %vm83_vm0, %v24_v38  ;;  %949 = vmatmul.mubr.msk.f32.gmra.mrb[12].mxu1 %vm83_vm0, %v56_v39 }
  0x2d   :  { %903 = vmatprep.mubr.msk.f32.mxu0 %vm83_vm0, %v25_v40  ;;  %951 = vmatprep.mubr.msk.f32.mxu1 %vm83_vm0, %v57_v41 }
  0x30   :  { %904 = vmatmul.mubr.msk.f32.gmra.mrb[14].mxu0 %vm83_vm0, %v26_v42  ;;  %952 = vmatmul.mubr.msk.f32.gmra.mrb[14].mxu1 %vm83_vm0, %v58_v43 }
  0x31   :  { %906 = vmatprep.mubr.msk.f32.mxu0 %vm83_vm0, %v27_v44  ;;  %954 = vmatprep.mubr.msk.f32.mxu1 %vm83_vm0, %v59_v45 }
  0x34   :  { %907 = vmatmul.mubr.msk.f32.gmra.mrb[16].mxu0 %vm83_vm0, %v28_v46  ;;  %955 = vmatmul.mubr.msk.f32.gmra.mrb[16].mxu1 %vm83_vm0, %v60_v47 }
  0x35   :  { %909 = vmatprep.mubr.msk.f32.mxu0 %vm83_vm0, %v29_v48  ;;  %957 = vmatprep.mubr.msk.f32.mxu1 %vm83_vm0, %v61_v49 }
  0x38   :  { %910 = vmatmul.mubr.msk.f32.gmra.mrb[18].mxu0 %vm83_vm0, %v30_v50  ;;  %958 = vmatmul.mubr.msk.f32.gmra.mrb[18].mxu1 %vm83_vm0, %v62_v51 }
  0x39   :  { %912 = vmatprep.mubr.msk.f32.mxu0 %vm83_vm0, %v31_v52  ;;  %960 = vmatprep.mubr.msk.f32.mxu1 %vm83_vm0, %v63_v53 }
  0x3c   :  { %913 = vmatmul.mubr.msk.f32.gmra.mrb[20].mxu0 %vm83_vm0, %v32_v54  ;;  %961 = vmatmul.mubr.msk.f32.gmra.mrb[20].mxu1 %vm83_vm0, %v64_v55 }
  0x3d   :  { %915 = vmatprep.mubr.msk.f32.mxu0 %vm83_vm0, %v33_v56  ;;  %963 = vmatprep.mubr.msk.f32.mxu1 %vm83_vm0, %v65_v57 }
  0x40   :  { %916 = vmatmul.mubr.msk.f32.gmra.mrb[22].mxu0 %vm83_vm0, %v34_v58  ;;  %964 = vmatmul.mubr.msk.f32.gmra.mrb[22].mxu1 %vm83_vm0, %v66_v59 }
  0x41   :  { %918 = vmatprep.mubr.msk.f32.mxu0 %vm83_vm0, %v35_v60  ;;  %966 = vmatprep.mubr.msk.f32.mxu1 %vm83_vm0, %v67_v61 }
  0x44   :  { %919 = vmatmul.mubr.msk.f32.gmra.mrb[24].mxu0 %vm83_vm0, %v36_v62  ;;  %967 = vmatmul.mubr.msk.f32.gmra.mrb[24].mxu1 %vm83_vm0, %v68_v63 }
  0x45   :  { %921 = vmatprep.mubr.msk.f32.mxu0 %vm83_vm0, %v37_v0  ;;  %969 = vmatprep.mubr.msk.f32.mxu1 %vm83_vm0, %v69_v1 }
  0x48   :  { %922 = vmatmul.mubr.msk.f32.gmra.mrb[26].mxu0 %vm83_vm0, %v38_v2  ;;  %970 = vmatmul.mubr.msk.f32.gmra.mrb[26].mxu1 %vm83_vm0, %v70_v3 }
  0x49   :  { %924 = vmatprep.mubr.msk.f32.mxu0 %vm83_vm0, %v39_v4  ;;  %972 = vmatprep.mubr.msk.f32.mxu1 %vm83_vm0, %v71_v5 }
  0x4c   :  { %925 = vmatmul.mubr.msk.f32.gmra.mrb[28].mxu0 %vm83_vm0, %v40_v6  ;;  %973 = vmatmul.mubr.msk.f32.gmra.mrb[28].mxu1 %vm83_vm0, %v72_v7 }
  0x4d   :  { %927 = vmatprep.mubr.msk.f32.mxu0 %vm83_vm0, %v41_v8  ;;  %975 = vmatprep.mubr.msk.f32.mxu1 %vm83_vm0, %v73_v9 }
  0x50   :  { %928 = vmatmul.mubr.msk.f32.gmra.mrb[30].mxu0 %vm83_vm0, %v42_v10  ;;  %976 = vmatmul.mubr.msk.f32.gmra.mrb[30].mxu1 %vm83_vm0, %v74_v11 }
  0xe7   :  { %v884_v12 = vpop.f32.mrb[0].mxu0  ;;  %v932_v13 = vpop.f32.mrb[0].mxu1 }
  0xe8   :  { %663 = vst.msk [vmem:[%s1555_s2 + $0x8] sm:$0xff] %vm661_vm1, %v884_v12  ;;  %695 = vst.msk [vmem:[%s1555_s2 + $0x108] sm:$0xff] %vm661_vm1, %v932_v13  ;;  %v342_v14 = vpop.f32.mrb[1].mxu0  ;;  %v502_v15 = vpop.f32.mrb[1].mxu1 }
  0xe9   :  { %662 = vst.msk [vmem:[%s1555_s2] sm:$0xff] %vm661_vm1, %v342_v14  ;;  %694 = vst.msk [vmem:[%s1555_s2 + $0x100] sm:$0xff] %vm661_vm1, %v502_v15 }
  0xeb   :  { %v887_v16 = vpop.f32.mrb[2].mxu0  ;;  %v935_v17 = vpop.f32.mrb[2].mxu1 }
  0xec   :  { %665 = vst.msk [vmem:[%s1555_s2 + $0x18] sm:$0xff] %vm661_vm1, %v887_v16  ;;  %697 = vst.msk [vmem:[%s1555_s2 + $0x118] sm:$0xff] %vm661_vm1, %v935_v17  ;;  %v352_v18 = vpop.f32.mrb[3].mxu0  ;;  %v512_v19 = vpop.f32.mrb[3].mxu1 }
  0xed   :  { %664 = vst.msk [vmem:[%s1555_s2 + $0x10] sm:$0xff] %vm661_vm1, %v352_v18  ;;  %696 = vst.msk [vmem:[%s1555_s2 + $0x110] sm:$0xff] %vm661_vm1, %v512_v19 }
  0xef   :  { %v890_v20 = vpop.f32.mrb[4].mxu0  ;;  %v938_v21 = vpop.f32.mrb[4].mxu1 }
  0xf0   :  { %667 = vst.msk [vmem:[%s1555_s2 + $0x28] sm:$0xff] %vm661_vm1, %v890_v20  ;;  %699 = vst.msk [vmem:[%s1555_s2 + $0x128] sm:$0xff] %vm661_vm1, %v938_v21  ;;  %v362_v22 = vpop.f32.mrb[5].mxu0  ;;  %v522_v23 = vpop.f32.mrb[5].mxu1 }
  0xf1   :  { %666 = vst.msk [vmem:[%s1555_s2 + $0x20] sm:$0xff] %vm661_vm1, %v362_v22  ;;  %698 = vst.msk [vmem:[%s1555_s2 + $0x120] sm:$0xff] %vm661_vm1, %v522_v23 }
  0xf3   :  { %v893_v24 = vpop.f32.mrb[6].mxu0  ;;  %v941_v25 = vpop.f32.mrb[6].mxu1 }
  0xf4   :  { %669 = vst.msk [vmem:[%s1555_s2 + $0x38] sm:$0xff] %vm661_vm1, %v893_v24  ;;  %701 = vst.msk [vmem:[%s1555_s2 + $0x138] sm:$0xff] %vm661_vm1, %v941_v25  ;;  %v372_v26 = vpop.f32.mrb[7].mxu0  ;;  %v532_v27 = vpop.f32.mrb[7].mxu1 }
  0xf5   :  { %668 = vst.msk [vmem:[%s1555_s2 + $0x30] sm:$0xff] %vm661_vm1, %v372_v26  ;;  %700 = vst.msk [vmem:[%s1555_s2 + $0x130] sm:$0xff] %vm661_vm1, %v532_v27 }
  0xf7   :  { %v896_v28 = vpop.f32.mrb[8].mxu0  ;;  %v944_v29 = vpop.f32.mrb[8].mxu1 }
  0xf8   :  { %671 = vst.msk [vmem:[%s1555_s2 + $0x48] sm:$0xff] %vm661_vm1, %v896_v28  ;;  %703 = vst.msk [vmem:[%s1555_s2 + $0x148] sm:$0xff] %vm661_vm1, %v944_v29  ;;  %v382_v30 = vpop.f32.mrb[9].mxu0  ;;  %v542_v31 = vpop.f32.mrb[9].mxu1 }
  0xf9   :  { %670 = vst.msk [vmem:[%s1555_s2 + $0x40] sm:$0xff] %vm661_vm1, %v382_v30  ;;  %702 = vst.msk [vmem:[%s1555_s2 + $0x140] sm:$0xff] %vm661_vm1, %v542_v31 }
  0xfb   :  { %v899_v32 = vpop.f32.mrb[10].mxu0  ;;  %v947_v33 = vpop.f32.mrb[10].mxu1 }
  0xfc   :  { %673 = vst.msk [vmem:[%s1555_s2 + $0x58] sm:$0xff] %vm661_vm1, %v899_v32  ;;  %705 = vst.msk [vmem:[%s1555_s2 + $0x158] sm:$0xff] %vm661_vm1, %v947_v33  ;;  %v392_v34 = vpop.f32.mrb[11].mxu0  ;;  %v552_v35 = vpop.f32.mrb[11].mxu1 }
  0xfd   :  { %672 = vst.msk [vmem:[%s1555_s2 + $0x50] sm:$0xff] %vm661_vm1, %v392_v34  ;;  %704 = vst.msk [vmem:[%s1555_s2 + $0x150] sm:$0xff] %vm661_vm1, %v552_v35 }
  0xff   :  { %v902_v36 = vpop.f32.mrb[12].mxu0  ;;  %v950_v37 = vpop.f32.mrb[12].mxu1 }
 0x100   :  { %675 = vst.msk [vmem:[%s1555_s2 + $0x68] sm:$0xff] %vm661_vm1, %v902_v36  ;;  %707 = vst.msk [vmem:[%s1555_s2 + $0x168] sm:$0xff] %vm661_vm1, %v950_v37  ;;  %v402_v38 = vpop.f32.mrb[13].mxu0  ;;  %v562_v39 = vpop.f32.mrb[13].mxu1 }
 0x101   :  { %674 = vst.msk [vmem:[%s1555_s2 + $0x60] sm:$0xff] %vm661_vm1, %v402_v38  ;;  %706 = vst.msk [vmem:[%s1555_s2 + $0x160] sm:$0xff] %vm661_vm1, %v562_v39 }
 0x103   :  { %v905_v40 = vpop.f32.mrb[14].mxu0  ;;  %v953_v41 = vpop.f32.mrb[14].mxu1 }
 0x104   :  { %677 = vst.msk [vmem:[%s1555_s2 + $0x78] sm:$0xff] %vm661_vm1, %v905_v40  ;;  %709 = vst.msk [vmem:[%s1555_s2 + $0x178] sm:$0xff] %vm661_vm1, %v953_v41  ;;  %v412_v42 = vpop.f32.mrb[15].mxu0  ;;  %v572_v43 = vpop.f32.mrb[15].mxu1 }
 0x105   :  { %676 = vst.msk [vmem:[%s1555_s2 + $0x70] sm:$0xff] %vm661_vm1, %v412_v42  ;;  %708 = vst.msk [vmem:[%s1555_s2 + $0x170] sm:$0xff] %vm661_vm1, %v572_v43 }
 0x107   :  { %v908_v44 = vpop.f32.mrb[16].mxu0  ;;  %v956_v45 = vpop.f32.mrb[16].mxu1 }
 0x108   :  { %679 = vst.msk [vmem:[%s1555_s2 + $0x88] sm:$0xff] %vm661_vm1, %v908_v44  ;;  %711 = vst.msk [vmem:[%s1555_s2 + $0x188] sm:$0xff] %vm661_vm1, %v956_v45  ;;  %v422_v46 = vpop.f32.mrb[17].mxu0  ;;  %v582_v47 = vpop.f32.mrb[17].mxu1 }
 0x109   :  { %678 = vst.msk [vmem:[%s1555_s2 + $0x80] sm:$0xff] %vm661_vm1, %v422_v46  ;;  %710 = vst.msk [vmem:[%s1555_s2 + $0x180] sm:$0xff] %vm661_vm1, %v582_v47 }
 0x10b   :  { %v911_v48 = vpop.f32.mrb[18].mxu0  ;;  %v959_v49 = vpop.f32.mrb[18].mxu1 }
 0x10c   :  { %681 = vst.msk [vmem:[%s1555_s2 + $0x98] sm:$0xff] %vm661_vm1, %v911_v48  ;;  %713 = vst.msk [vmem:[%s1555_s2 + $0x198] sm:$0xff] %vm661_vm1, %v959_v49  ;;  %v432_v50 = vpop.f32.mrb[19].mxu0  ;;  %v592_v51 = vpop.f32.mrb[19].mxu1 }
 0x10d   :  { %680 = vst.msk [vmem:[%s1555_s2 + $0x90] sm:$0xff] %vm661_vm1, %v432_v50  ;;  %712 = vst.msk [vmem:[%s1555_s2 + $0x190] sm:$0xff] %vm661_vm1, %v592_v51 }
 0x10f   :  { %v914_v52 = vpop.f32.mrb[20].mxu0  ;;  %v962_v53 = vpop.f32.mrb[20].mxu1 }
 0x110   :  { %683 = vst.msk [vmem:[%s1555_s2 + $0xa8] sm:$0xff] %vm661_vm1, %v914_v52  ;;  %715 = vst.msk [vmem:[%s1555_s2 + $0x1a8] sm:$0xff] %vm661_vm1, %v962_v53  ;;  %v442_v54 = vpop.f32.mrb[21].mxu0  ;;  %v602_v55 = vpop.f32.mrb[21].mxu1 }
 0x111   :  { %682 = vst.msk [vmem:[%s1555_s2 + $0xa0] sm:$0xff] %vm661_vm1, %v442_v54  ;;  %714 = vst.msk [vmem:[%s1555_s2 + $0x1a0] sm:$0xff] %vm661_vm1, %v602_v55 }
 0x113   :  { %v917_v56 = vpop.f32.mrb[22].mxu0  ;;  %v965_v57 = vpop.f32.mrb[22].mxu1 }
 0x114   :  { %685 = vst.msk [vmem:[%s1555_s2 + $0xb8] sm:$0xff] %vm661_vm1, %v917_v56  ;;  %717 = vst.msk [vmem:[%s1555_s2 + $0x1b8] sm:$0xff] %vm661_vm1, %v965_v57  ;;  %v452_v58 = vpop.f32.mrb[23].mxu0  ;;  %v612_v59 = vpop.f32.mrb[23].mxu1 }
 0x115   :  { %684 = vst.msk [vmem:[%s1555_s2 + $0xb0] sm:$0xff] %vm661_vm1, %v452_v58  ;;  %716 = vst.msk [vmem:[%s1555_s2 + $0x1b0] sm:$0xff] %vm661_vm1, %v612_v59 }
 0x117   :  { %v920_v60 = vpop.f32.mrb[24].mxu0  ;;  %v968_v61 = vpop.f32.mrb[24].mxu1 }
 0x118   :  { %687 = vst.msk [vmem:[%s1555_s2 + $0xc8] sm:$0xff] %vm661_vm1, %v920_v60  ;;  %719 = vst.msk [vmem:[%s1555_s2 + $0x1c8] sm:$0xff] %vm661_vm1, %v968_v61  ;;  %v462_v62 = vpop.f32.mrb[25].mxu0  ;;  %v622_v63 = vpop.f32.mrb[25].mxu1 }
 0x119   :  { %686 = vst.msk [vmem:[%s1555_s2 + $0xc0] sm:$0xff] %vm661_vm1, %v462_v62  ;;  %718 = vst.msk [vmem:[%s1555_s2 + $0x1c0] sm:$0xff] %vm661_vm1, %v622_v63 }
 0x11b   :  { %v923_v0 = vpop.f32.mrb[26].mxu0  ;;  %v971_v1 = vpop.f32.mrb[26].mxu1 }
 0x11c   :  { %689 = vst.msk [vmem:[%s1555_s2 + $0xd8] sm:$0xff] %vm661_vm1, %v923_v0  ;;  %721 = vst.msk [vmem:[%s1555_s2 + $0x1d8] sm:$0xff] %vm661_vm1, %v971_v1  ;;  %v472_v2 = vpop.f32.mrb[27].mxu0  ;;  %v632_v3 = vpop.f32.mrb[27].mxu1 }
 0x11d   :  { %688 = vst.msk [vmem:[%s1555_s2 + $0xd0] sm:$0xff] %vm661_vm1, %v472_v2  ;;  %720 = vst.msk [vmem:[%s1555_s2 + $0x1d0] sm:$0xff] %vm661_vm1, %v632_v3 }
 0x11f   :  { %v926_v4 = vpop.f32.mrb[28].mxu0  ;;  %v974_v5 = vpop.f32.mrb[28].mxu1 }
 0x120   :  { %691 = vst.msk [vmem:[%s1555_s2 + $0xe8] sm:$0xff] %vm661_vm1, %v926_v4  ;;  %723 = vst.msk [vmem:[%s1555_s2 + $0x1e8] sm:$0xff] %vm661_vm1, %v974_v5  ;;  %v482_v6 = vpop.f32.mrb[29].mxu0  ;;  %v642_v7 = vpop.f32.mrb[29].mxu1 }
 0x121   :  { %690 = vst.msk [vmem:[%s1555_s2 + $0xe0] sm:$0xff] %vm661_vm1, %v482_v6  ;;  %722 = vst.msk [vmem:[%s1555_s2 + $0x1e0] sm:$0xff] %vm661_vm1, %v642_v7 }
 0x123   :  { %v929_v8 = vpop.f32.mrb[30].mxu0  ;;  %v977_v9 = vpop.f32.mrb[30].mxu1 }
 0x124   :  { %693 = vst.msk [vmem:[%s1555_s2 + $0xf8] sm:$0xff] %vm661_vm1, %v929_v8  ;;  %725 = vst.msk [vmem:[%s1555_s2 + $0x1f8] sm:$0xff] %vm661_vm1, %v977_v9  ;;  %v492_v10 = vpop.f32.mrb[31].mxu0  ;;  %v652_v11 = vpop.f32.mrb[31].mxu1 }
 0x125   :  { %692 = vst.msk [vmem:[%s1555_s2 + $0xf0] sm:$0xff] %vm661_vm1, %v492_v10  ;;  %724 = vst.msk [vmem:[%s1555_s2 + $0x1f0] sm:$0xff] %vm661_vm1, %v652_v11 }

</bundles_post_ra>
